<compile_context>
chip_gen: v5e
topology: v5e:2x2
jax: 0.10.0
libtpu: 0.0.40
codegen_flags: <defaults>
</compile_context>

<pallas_src>
import functools
import math

import numpy as np
import jax
import jax.numpy as jnp
from jax import lax
from jax.experimental import pallas as pl
from jax.experimental.pallas import tpu as pltpu

# ----------------------------- configuration --------------------------------
PATCH = 4                 # surrogate encoder downsample factor
FDIM = 256                # fnet output_dim
HIDDEN = 128              # RAFT hidden_dim
CONTEXT = 128             # RAFT context_dim
LEVELS = 4                # corr_levels
RADIUS = 4                # corr_radius
NSAMP = (2 * RADIUS + 1) ** 2   # 81 samples per level

_VMEM_LIMIT = 48 * 1024 * 1024  # safe on v5e/v6e (128 MiB) and v7x (64 MiB)


# ----------------------------- generic matmul -------------------------------
def _matmul_bias_kernel(x_ref, w_ref, b_ref, o_ref):
    o_ref[...] = (jnp.dot(x_ref[...], w_ref[...],
                          preferred_element_type=jnp.float32) + b_ref[...])


def matmul_bias(x, w, b, tile_m=512):
    M, K = x.shape
    N = w.shape[1]
    tile_m = min(tile_m, M)
    assert M % tile_m == 0
    return pl.pallas_call(
        _matmul_bias_kernel,
        out_shape=jax.ShapeDtypeStruct((M, N), jnp.float32),
        grid=(M // tile_m,),
        in_specs=[pl.BlockSpec((tile_m, K), lambda i: (i, 0)),
                  pl.BlockSpec((K, N), lambda i: (0, 0)),
                  pl.BlockSpec((1, N), lambda i: (0, 0))],
        out_specs=pl.BlockSpec((tile_m, N), lambda i: (i, 0)),
        compiler_params=pltpu.CompilerParams(dimension_semantics=("parallel",)),
    )(x, w, b)


# --------------------------- context net (cnet) ------------------------------
def _cnet_kernel(x_ref, w_ref, b_ref, net_ref, inp_ref, *, hidden):
    c = jnp.dot(x_ref[...], w_ref[...],
                preferred_element_type=jnp.float32) + b_ref[...]
    net_ref[...] = jnp.tanh(c[:, :hidden])          # torch.tanh(net)
    inp_ref[...] = jax.nn.relu(c[:, hidden:])       # torch.relu(inp)


def cnet_forward(x, w, b, hidden=HIDDEN, tile_m=512):
    M, K = x.shape
    C = w.shape[1]
    tile_m = min(tile_m, M)
    assert M % tile_m == 0
    kern = functools.partial(_cnet_kernel, hidden=hidden)
    return pl.pallas_call(
        kern,
        out_shape=(jax.ShapeDtypeStruct((M, hidden), jnp.float32),
                   jax.ShapeDtypeStruct((M, C - hidden), jnp.float32)),
        grid=(M // tile_m,),
        in_specs=[pl.BlockSpec((tile_m, K), lambda i: (i, 0)),
                  pl.BlockSpec((K, C), lambda i: (0, 0)),
                  pl.BlockSpec((1, C), lambda i: (0, 0))],
        out_specs=[pl.BlockSpec((tile_m, hidden), lambda i: (i, 0)),
                   pl.BlockSpec((tile_m, C - hidden), lambda i: (i, 0))],
        compiler_params=pltpu.CompilerParams(dimension_semantics=("parallel",)),
    )(x, w, b)


# --------------------------- correlation volume ------------------------------
def _corr_kernel(f1_ref, f2_ref, o_ref, *, scale):
    # contract last dims directly (no explicit transpose -> MXU-friendly)
    o_ref[0] = lax.dot_general(
        f1_ref[0], f2_ref[0],
        dimension_numbers=(((1,), (1,)), ((), ())),
        preferred_element_type=jnp.float32) * scale


def correlation(fmap1, fmap2, tile_i=256):
    """fmap1: (N, HW1, C) bf16, fmap2: (N, HW2, C) bf16 ->
    corr[n, i, j] = <f1[n,i], f2[n,j]> / sqrt(C) in f32, tiled over rows."""
    N, HW1, C = fmap1.shape
    HW2 = fmap2.shape[1]
    tile_i = min(tile_i, HW1)
    assert HW1 % tile_i == 0
    kern = functools.partial(_corr_kernel, scale=1.0 / math.sqrt(C))
    return pl.pallas_call(
        kern,
        out_shape=jax.ShapeDtypeStruct((N, HW1, HW2), jnp.float32),
        grid=(N, HW1 // tile_i),
        in_specs=[pl.BlockSpec((1, tile_i, C), lambda b, i: (b, i, 0)),
                  pl.BlockSpec((1, HW2, C), lambda b, i: (b, 0, 0))],
        out_specs=pl.BlockSpec((1, tile_i, HW2), lambda b, i: (b, i, 0)),
        compiler_params=pltpu.CompilerParams(
            dimension_semantics=("parallel", "parallel"),
            vmem_limit_bytes=_VMEM_LIMIT),
    )(fmap1, fmap2)


# ---------------- fused iterative update (lookup + GRU + loss terms) ---------
# TODO(synk): BasicUpdateBlock is not defined in the provided source; this is a
# deterministic 1x1-conv motion-encoder + ConvGRU + flow/mask-head surrogate
# with the same (net, inp, corr, flow) -> (net, up_mask, delta_flow) interface.
_UPD_WNAMES = ['bm', 'whzr', 'whq', 'wxi', 'wxm', 'bg',
               'wf1', 'bf1', 'wf2', 'bf2', 'wmask', 'bmask']


def _raft_iter_kernel(*refs, iters, hidden, radius, num_levels):
    f32 = jnp.float32
    num = 2 * radius + 1
    ns = num * num

    pyr_refs = refs[:num_levels]
    c0_ref, gt_ref, net0_ref, inp_ref = refs[num_levels:num_levels + 4]
    idx = num_levels + 4
    wm_refs = refs[idx:idx + num_levels]
    idx += num_levels
    (wmf_ref, bm_ref, whzr_ref, whq_ref, wxi_ref, wxm_ref, bg_ref,
     wf1_ref, bf1_ref, wf2_ref, bf2_ref, wmask_ref, bmask_ref) = refs[idx:idx + 13]
    idx += 13
    preds_ref, absd_ref, epe_ref, mask_ref = refs[idx:]

    # load everything once; it stays VMEM-resident across all iterations
    pyr = [r[...] for r in pyr_refs]                 # [(tm, h_l, w_l)] f32
    coords0 = c0_ref[...]                            # (tm, 2) (x, y)
    gt = gt_ref[...]                                 # (tm, 2)
    net0 = net0_ref[...]                             # (tm, hidden)
    inp = inp_ref[...]                               # (tm, hidden)
    wm = [r[...] for r in wm_refs]                   # [(81, hidden)]
    wmf = wmf_ref[...]                               # (2, hidden)
    bm = bm_ref[...]
    whzr = whzr_ref[...]
    whq = whq_ref[...]
    wxi = wxi_ref[...]                               # (hidden, 3*hidden)
    wxm = wxm_ref[...]                               # (hidden, 3*hidden)
    bg = bg_ref[...]
    wf1 = wf1_ref[...]
    bf1 = bf1_ref[...]
    wf2 = wf2_ref[...]
    bf2 = bf2_ref[...]
    wmask = wmask_ref[...]
    bmask = bmask_ref[...]

    # ---- iteration-invariant hoists (JAX does not CSE these inside loops) ---
    # ConvGRU input-gate contribution of the (static) context features.
    gi_inp = jnp.dot(inp, wxi, preferred_element_type=f32) + bg   # (tm, 3h)

    # Lookup offset / grid constants. RAFT delta ordering: meshgrid(dy, dx) ->
    # s = a*num + b, where a is added to the x (width) coord and b to the y
    # (height) coord (symmetric [-r, r] ranges, matches the reference).
    s_idx = lax.broadcasted_iota(jnp.int32, (1, ns), 1)
    off_x = (s_idx // num).astype(f32) - radius      # (1, ns)
    off_y = (s_idx % num).astype(f32) - radius       # (1, ns)
    gxs = [lax.broadcasted_iota(jnp.int32, (1, 1, pyr[l].shape[2]), 2).astype(f32)
           for l in range(num_levels)]
    gys = [lax.broadcasted_iota(jnp.int32, (1, pyr[l].shape[1], 1), 1).astype(f32)
           for l in range(num_levels)]

    def lookup(l, coords):
        # bilinear grid_sample(align_corners=True, padding='zeros') expressed
        # as a separable tent-weight contraction (mathematically identical).
        # TODO(synk): a gather-based 4-tap form would cut FLOPs further.
        corr = pyr[l]
        c = coords * (1.0 / (2 ** l))                   # pixel coords / 2^lvl
        cx = c[:, 0:1]
        cy = c[:, 1:2]
        sx = cx + off_x                                 # (tm, ns) width coord
        sy = cy + off_y                                 # (tm, ns) height coord
        wx = jnp.maximum(0.0, 1.0 - jnp.abs(sx[:, :, None] - gxs[l]))  # (tm,ns,w)
        wy = jnp.maximum(0.0, 1.0 - jnp.abs(sy[:, None, :] - gys[l]))  # (tm,h,ns)
        t1 = jnp.einsum('mhw,msw->mhs', corr, wx,
                        preferred_element_type=f32)                    # (tm,h,ns)
        return jnp.sum(t1 * wy, axis=1)                                # (tm,ns)

    def step(it, carry):
        net, coords1 = carry
        flow = coords1 - coords0
        # motion encoder: split motion weight per level (avoids a 326-wide
        # lane concat; the sum of dots is identical to [corr|flow] @ wm).
        mpre = jnp.dot(flow, wmf, preferred_element_type=f32) + bm
        for l in range(num_levels):
            cf = lookup(l, coords1)                                 # (tm, 81)
            mpre = mpre + jnp.dot(cf, wm[l], preferred_element_type=f32)
        motion = jax.nn.relu(mpre)                                  # (tm, h)
        # ConvGRU; static-context contribution was hoisted out of the loop.
        gi = gi_inp + jnp.dot(motion, wxm, preferred_element_type=f32)  # (tm,3h)
        hzr = jnp.dot(net, whzr, preferred_element_type=f32)        # (tm, 2h)
        z = jax.nn.sigmoid(hzr[:, :hidden] + gi[:, :hidden])
        r = jax.nn.sigmoid(hzr[:, hidden:] + gi[:, hidden:2 * hidden])
        q = jnp.tanh(jnp.dot(r * net, whq, preferred_element_type=f32)
                     + gi[:, 2 * hidden:])
        net = (1.0 - z) * net + z * q
        # flow head
        fh = jax.nn.relu(jnp.dot(net, wf1, preferred_element_type=f32) + bf1)
        delta = jnp.dot(fh, wf2, preferred_element_type=f32) + bf2  # (tm, 2)
        coords1 = coords1 + delta
        fp = coords1 - coords0
        preds_ref[it] = fp
        # per-pixel |err| channel-sum for the sequence loss
        absd_ref[it] = jnp.sum(jnp.abs(fp - gt), axis=1, keepdims=True)
        return (net, coords1)

    net_fin, coords1_fin = lax.fori_loop(0, iters, step, (net0, coords0))

    # up_mask head (returned by BasicUpdateBlock; unused downstream, as in the
    # reference forward)
    mask_ref[...] = jnp.dot(net_fin, wmask,
                            preferred_element_type=f32) + bmask
    # per-pixel end-point-error of the final prediction
    e = (coords1_fin - coords0) - gt
    epe_ref[...] = jnp.sqrt(jnp.sum(e * e, axis=1, keepdims=True))


def raft_iterations(pyr, coords0, gt, net, inp, params, iters, tile_m=256):
    M, hidden = net.shape
    tile_m = min(tile_m, M)
    assert M % tile_m == 0
    mask_ch = params['wmask'].shape[1]

    # split the motion-encoder weight into per-level + flow pieces
    wm = params['wm']
    w_args = [wm[l * NSAMP:(l + 1) * NSAMP] for l in range(LEVELS)]
    w_args.append(wm[LEVELS * NSAMP:])
    w_args += [params[n] for n in _UPD_WNAMES]

    per_pix = lambda i: (i, 0)
    in_specs = [pl.BlockSpec((tile_m,) + lv.shape[1:], lambda i: (i, 0, 0))
                for lv in pyr]
    in_specs += [pl.BlockSpec((tile_m, 2), per_pix),        # coords0
                 pl.BlockSpec((tile_m, 2), per_pix),        # gt
                 pl.BlockSpec((tile_m, hidden), per_pix),   # net
                 pl.BlockSpec((tile_m, hidden), per_pix)]   # inp
    in_specs += [pl.BlockSpec(w.shape, lambda i: (0, 0)) for w in w_args]

    out_shape = (jax.ShapeDtypeStruct((iters, M, 2), jnp.float32),   # preds
                 jax.ShapeDtypeStruct((iters, M, 1), jnp.float32),   # |err|
                 jax.ShapeDtypeStruct((M, 1), jnp.float32),          # epe
                 jax.ShapeDtypeStruct((M, mask_ch), jnp.float32))    # up_mask
    out_specs = [pl.BlockSpec((iters, tile_m, 2), lambda i: (0, i, 0)),
                 pl.BlockSpec((iters, tile_m, 1), lambda i: (0, i, 0)),
                 pl.BlockSpec((tile_m, 1), per_pix),
                 pl.BlockSpec((tile_m, mask_ch), per_pix)]

    kern = functools.partial(_raft_iter_kernel, iters=iters, hidden=hidden,
                             radius=RADIUS, num_levels=len(pyr))
    return pl.pallas_call(
        kern,
        out_shape=out_shape,
        grid=(M // tile_m,),
        in_specs=in_specs,
        out_specs=out_specs,
        compiler_params=pltpu.CompilerParams(
            dimension_semantics=("parallel",),
            vmem_limit_bytes=_VMEM_LIMIT),
    )(*pyr, coords0, gt, net, inp, *w_args)


# --------------------------------- glue ---------------------------------------
def make_coords(N, h, w):
    ys, xs = jnp.meshgrid(jnp.arange(h, dtype=jnp.float32),
                          jnp.arange(w, dtype=jnp.float32), indexing='ij')
    c = jnp.stack([xs, ys], axis=-1).reshape(h * w, 2)   # channel order (x, y)
    return jnp.tile(c, (N, 1))


def init_params(key):
    cm = LEVELS * NSAMP + 2
    mask_ch = (PATCH ** 2) * 9
    shapes = {
        'fnet_w': (PATCH * PATCH, FDIM), 'fnet_b': (1, FDIM),
        'cnet_w': (PATCH * PATCH, HIDDEN + CONTEXT), 'cnet_b': (1, HIDDEN + CONTEXT),
        'wm': (cm, HIDDEN), 'bm': (1, HIDDEN),
        'whzr': (HIDDEN, 2 * HIDDEN), 'whq': (HIDDEN, HIDDEN),
        'wxi': (HIDDEN, 3 * HIDDEN), 'wxm': (HIDDEN, 3 * HIDDEN),
        'bg': (1, 3 * HIDDEN),
        'wf1': (HIDDEN, HIDDEN), 'bf1': (1, HIDDEN),
        'wf2': (HIDDEN, 2), 'bf2': (1, 2),
        'wmask': (HIDDEN, mask_ch), 'bmask': (1, mask_ch),
    }
    params = {}
    keys = jax.random.split(key, len(shapes))
    for (name, shp), k in zip(shapes.items(), keys):
        fan_in = shp[0]
        params[name] = 0.5 * jax.random.normal(k, shp, jnp.float32) / math.sqrt(fan_in)
    return params


def raft_forward(input_img, flowl0, params, iters=4):
    """input_img: (N, 2, H, W) NCHW, flowl0: (N, 2, H/PATCH, W/PATCH) NCHW."""
    N, _, H, W = input_img.shape
    p = PATCH
    h1, w1 = H // p, W // p
    HW = h1 * w1
    M = N * HW

    img1 = input_img[:, 0:1]
    img2 = input_img[:, 1:2]

    def patchify(img):
        x = img.reshape(N, 1, h1, p, w1, p)
        x = x.transpose(0, 2, 4, 1, 3, 5).reshape(N * HW, p * p)
        return x.astype(jnp.float32)

    x1 = patchify(img1)
    x2 = patchify(img2)

    # TODO(synk): BasicEncoder (ResNet + instance norm, output_dim=256) is not
    # defined in the provided source; using a deterministic patch-embedding
    # surrogate (stride-PATCH linear projection in a Pallas matmul kernel).
    # Both images go through ONE matmul kernel (stacked along M).
    fboth = matmul_bias(jnp.concatenate([x1, x2], axis=0),
                        params['fnet_w'], params['fnet_b'])
    fmap1, fmap2 = fboth[:M], fboth[M:]

    # cnet -> split(hidden, context) -> tanh / relu (fused in one kernel)
    net, inp = cnet_forward(x1, params['cnet_w'], params['cnet_b'])

    # ----- CorrBlock: all-pairs correlation + avg-pool pyramid -----
    # avg_pool2d over the image-2 spatial dims commutes with the (linear)
    # correlation, so each pyramid level is one bf16 matmul against a spatially
    # pooled fmap2 (no dense pooling matmul, no extra HBM pass over corr).
    f1b = fmap1.reshape(N, HW, FDIM).astype(jnp.bfloat16)
    cur = fmap2.reshape(N, h1, w1, FDIM)
    pyr = []
    h_l, w_l = h1, w1
    for lvl in range(LEVELS):
        f2l = cur.reshape(N, h_l * w_l, FDIM).astype(jnp.bfloat16)
        corr_l = correlation(f1b, f2l)                  # (N, HW, h_l*w_l) f32
        pyr.append(corr_l.reshape(M, h_l, w_l))
        if lvl < LEVELS - 1:
            cur = cur.reshape(N, h_l // 2, 2, w_l // 2, 2, FDIM).mean(axis=(2, 4))
            h_l //= 2
            w_l //= 2

    coords0 = make_coords(N, h1, w1)                    # (M, 2) (x, y)
    gt = flowl0.transpose(0, 2, 3, 1).reshape(M, 2).astype(jnp.float32)

    # fused iterative lookup + GRU updates + per-pixel loss terms
    preds_all, absd, epe, _up_mask = raft_iterations(
        pyr, coords0, gt, net, inp, params, iters)

    # sequence loss (matches the reference reductions); metrics stay on device
    abs_sum = jnp.sum(absd, axis=(1, 2))                # (iters,)
    weights_t = jnp.array([0.8 ** (iters - i - 1) for i in range(iters)],
                          jnp.float32)
    flow_loss = jnp.sum(weights_t * (abs_sum / (M * 2)))
    epe = epe[:, 0]
    metrics = {'epe': jnp.mean(epe),
               '1px': jnp.mean((epe < 1).astype(jnp.float32)),
               '3px': jnp.mean((epe < 3).astype(jnp.float32)),
               '5px': jnp.mean((epe < 5).astype(jnp.float32))}

    # one fused reshape + transpose to NCHW for all iterations
    preds_nchw_all = preds_all.reshape(iters, N, h1, w1, 2).transpose(0, 1, 4, 2, 3)
    preds_nchw = [preds_nchw_all[t] for t in range(iters)]
    return preds_nchw, (flow_loss, metrics)


# --------------------------------- main ---------------------------------------
if __name__ == "__main__":
    key = jax.random.PRNGKey(0)
    k_in, k_gt, k_par = jax.random.split(key, 3)

    N, H, W = 2, 64, 64
    h1, w1 = H // PATCH, W // PATCH
    input_img = jax.random.normal(k_in, (N, 2, H, W), jnp.float32)
    flowl0 = jax.random.normal(k_gt, (N, 2, h1, w1), jnp.float32)
    params = init_params(k_par)

    preds, (loss, metrics) = raft_forward(input_img, flowl0, params, iters=4)
    jax.block_until_ready(preds)
    loss = float(jax.block_until_ready(loss))
    metrics = {k: float(v) for k, v in metrics.items()}

    assert len(preds) == 4
    assert preds[-1].shape == (N, 2, h1, w1)
    assert np.isfinite(loss)
    assert all(np.isfinite(v) for v in metrics.values())
    print("KERNEL_OK")
</pallas_src>

<mosaic_0001>
module attributes {stable_mosaic.version = 11 : i64} {
  func.func @_matmul_bias_kernel(%arg0: i32, %arg1: memref<512x16xf32, #tpu.memory_space<vmem>>, %arg2: memref<16x256xf32, #tpu.memory_space<vmem>>, %arg3: memref<1x256xf32, #tpu.memory_space<vmem>>, %arg4: memref<512x256xf32, #tpu.memory_space<vmem>>) attributes {dimension_semantics = [#tpu.dimension_semantics<parallel>], iteration_bounds = array<i64: 2>, scalar_prefetch = 0 : i64, scratch_operands = 0 : i64, tpu.core_type = #tpu.core_type<tc>, window_params = [{transform_indices = @transform_0, window_bounds = array<i64: 512, 16>}, {pipeline_mode = #tpu.pipeline_mode<synchronous>, transform_indices = @transform_1, window_bounds = array<i64: 16, 256>}, {pipeline_mode = #tpu.pipeline_mode<synchronous>, transform_indices = @transform_2, window_bounds = array<i64: 1, 256>}, {transform_indices = @transform_3, window_bounds = array<i64: 512, 256>}]} {
    %c0 = arith.constant 0 : index
    %c0_0 = arith.constant 0 : index
    %0 = vector.load %arg1[%c0, %c0_0] : memref<512x16xf32, #tpu.memory_space<vmem>>, vector<512x16xf32>
    %c0_1 = arith.constant 0 : index
    %c0_2 = arith.constant 0 : index
    %1 = vector.load %arg2[%c0_1, %c0_2] : memref<16x256xf32, #tpu.memory_space<vmem>>, vector<16x256xf32>
    %cst = arith.constant dense<0.000000e+00> : vector<512x256xf32>
    %2 = tpu.matmul %0, %1, %cst {dimension_numbers = #tpu.dot_dimension_numbers<[1], [0], [0], [1], [0, 0, 1, 1], [], []>} : vector<512x16xf32>, vector<16x256xf32>, vector<512x256xf32> -> vector<512x256xf32>
    %c0_3 = arith.constant 0 : index
    %c0_4 = arith.constant 0 : index
    %3 = vector.load %arg3[%c0_3, %c0_4] : memref<1x256xf32, #tpu.memory_space<vmem>>, vector<1x256xf32>
    %4 = vector.broadcast %3 : vector<1x256xf32> to vector<512x256xf32>
    %5 = arith.addf %2, %4 : vector<512x256xf32>
    %c0_5 = arith.constant 0 : index
    %c0_6 = arith.constant 0 : index
    %6 = vector.load %arg4[%c0_5, %c0_6] : memref<512x256xf32, #tpu.memory_space<vmem>>, vector<512x256xf32>
    tpu.vector_store %arg4[%c0_5, %c0_6], %5 {strides = array<i32>} : memref<512x256xf32, #tpu.memory_space<vmem>>, vector<512x256xf32>,
    return
  }
  func.func @transform_0(%arg0: i32) -> (i32, i32) {
    %c0_i32 = arith.constant 0 : i32
    %c0_i32_0 = arith.constant 0 : i32
    return %arg0, %c0_i32 : i32, i32
  }
  func.func @transform_1(%arg0: i32) -> (i32, i32) {
    %c0_i32 = arith.constant 0 : i32
    %c0_i32_0 = arith.constant 0 : i32
    %c0_i32_1 = arith.constant 0 : i32
    return %c0_i32, %c0_i32_0 : i32, i32
  }
  func.func @transform_2(%arg0: i32) -> (i32, i32) {
    %c0_i32 = arith.constant 0 : i32
    %c0_i32_0 = arith.constant 0 : i32
    %c0_i32_1 = arith.constant 0 : i32
    return %c0_i32, %c0_i32_0 : i32, i32
  }
  func.func @transform_3(%arg0: i32) -> (i32, i32) {
    %c0_i32 = arith.constant 0 : i32
    %c0_i32_0 = arith.constant 0 : i32
    return %arg0, %c0_i32 : i32, i32
  }
}

</mosaic_0001>

<bundles_post_ra>
// kernel: tpu_custom_call.1
= control target key start
LH: loop header
LB: loop body
LE: loop exit
PB: predicated region body
PF: predicated region fallthrough
CT: control target
= control target key end

     0   :  { %8 = vsyncpa [#allocation3], 0  ;;  %s1898_s0 = inlined_call_operand.vmem [shape: f32[1024,16], index: 0, kind: input, shape index: {}]   ;;  %s1899_s1 = inlined_call_operand.vmem [shape: f32[16,256], index: 1, kind: input, shape index: {}]   ;;  %s1900_s2 = inlined_call_operand.vmem [shape: f32[1,256], index: 2, kind: input, shape index: {}]   ;;  %s1901_s3 = inlined_call_operand.hbm [shape: f32[1024,256], index: 3, kind: output, shape index: {}]  }
   0x1   :  { %10 = vsyncpa [#allocation3 + $0x1], 0  ;;  %s1338_s12 = smov 0   ;;  %s1340_s13 = smov 0  }
   0x2   :  { %s1342_s14 = smov 0   ;;  %s1344_s15 = smov 0  }
   0x3 LB: > { %s1359_s16 = sadd.s32 4294967295, %s1314_s15   ;;  %s1064_s17 = sadd.s32 4294967294, %s1314_s15   ;;  %s1314_s15 = sphi %s1344_s15, %s1907_s15   ;;  %s1310_s14 = sphi %s1342_s14, %s1906_s14   ;;  %s1306_s13 = sphi %s1340_s13, %s1905_s13   ;;  %s1302_s12 = sphi %s1338_s12, %s1904_s12  }
   0x4   : > { %s1363_s18 = sadd.s32 1, %s1314_s15   ;;  %s91_s19 = sadd.s32 1, %s1310_s14 }
   0x5   : > { %s88_s20 = ssub.s32 %s1314_s15, %s1363_s18  ;;  %p101_p0 = scmp.ne.s32.totalorder %s1310_s14, %s1306_s13 }
   0x6   : > { %p89_p1 = scmp.eq.s32.totalorder %s88_s20, 0  ;;  %p102_p2 = scmp.eq.s32.totalorder %s1359_s16, 1 }
   0x7   : > { %p107_p3 = scmp.ne.s32.totalorder %s1306_s13, %s1302_s12  ;;  %p108_p4 = scmp.eq.s32.totalorder %s1064_s17, 1 }
   0x8   : > { %s1374_s21 = scalar_select %p89_p1, %s1310_s14, %s91_s19  }
   0x9   : > { %p1376_p5 = por %p102_p2, %p101_p0  ;;  %p1380_p6 = por %p108_p4, %p107_p3 }
   0xa   : > { %p1067_p7 = scmp.ge.s32.totalorder %s1314_s15, 1  ;;  %p141_p8 = scmp.lt.s32.totalorder %s1314_s15, 3 }
   0xc   : > { %p142_p9 = pnand %p1067_p7, %p141_p8 }
   0xd   : > { %s1069_s30 = sshll.u32 (!%p142_p9), %s1359_s16, 6  ;;  %s162_s10 = sand.u32 (!%p142_p9), 1, %s1306_s13  }
   0xe   : > { %145 = sbr.rel (%p142_p9) target bundleno = 411 (0x19b), region = 32  ;;  %p166_p10 = scmp.lt.s32.totalorder (!%p142_p9), %s1069_s30, 127 }
   0xf   : > { %s1068_s19 = sshll.u32 (!%p142_p9), %s162_s10, 10  ;;  %s1206_s24 = sshll.u32 (!%p142_p9), %s1359_s16, 10 }
  0x10   : > { %s1516_s20 = scalar_lea.vmem (!%p142_p9), [#allocation2], %s1068_s19  ;;  %s998_s27 = scalar_lea.hbm (!%p142_p9), %s1901_s3, %s1206_s24 }
  0x11   : > { %s999_s16 = sshll.u32 (!%p142_p9), %s1516_s20, 4  ;;  %s1001_s28 = sshll.u32 (!%p142_p9), %s998_s27, 4  ;;  %s1000_s16 = int_to_ptr.vmem [resolvable:$true] %s999_s16  ;;  %s1002_s28 = int_to_ptr.hbm [resolvable:$true] %s1001_s28 }
  0x12   : > { %s986_s29 = scalar_lea.sflag (!%p142_p9), [#allocation3], %s162_s10  ;;  %s1272_s7 = scalar_lea.hbm (!%p142_p9), %s1901_s3, 2048 }
  0x13   : > { %v238_v0 = vld [vmem:[%s1899_s1 + $0x10] sm:$0xff]  ;;  %v239_v1 = vld [vmem:[%s1899_s1 + $0x18] sm:$0xff]  ;;  %v236_v2 = vld [vmem:[%s1899_s1] sm:$0xff]  ;;  %s1909_s30 = smov (!%p166_p10, %s1069_s30), 127  ;;  %vm246_vm0 = vcmask 130048  }
  0x14   : > { %1207 = vmatpush.msra.mxu2 %v238_v0  ;;  %1209 = vmatpush.msra.mxu3 %v239_v1  ;;  %v237_v3 = vld [vmem:[%s1899_s1 + $0x8] sm:$0xff]  ;;  %s1070_s6 = sshll.u32 %s1909_s30, 3  ;;  %v240_v36 = vld [vmem:[%s1900_s2] sm:$0x3]  ;;  %s1266_s30 = sshra.s32 %s1002_s28, 4  ;;  %s1267_s30 = int_to_ptr.hbm [resolvable:$true] %s1266_s30 }
  0x15   : > { %453 = vmatpush.msra.mxu0 %v238_v0  ;;  %662 = vmatpush.msra.mxu1 %v239_v1  ;;  %s1402_s9 = scalar_lea.vmem %s1898_s0, %s1070_s6  ;;  %v1506_v37 = vperm.slane %v240_v36, 0  ;;  %v1508_v38 = vperm.slane %v240_v36, 1  ;;  %s1268_s4 = scalar_lea.hbm %s1267_s30, 1024 }
  0x16   : > { %1208 = vmatpush.msra.mxu2 %v236_v2  ;;  %1210 = vmatpush.msra.mxu3 %v237_v3  ;;  %v204_v4 = vld [vmem:[%s1402_s9 + $0x100] sm:$0xff]  ;;  %v205_v6 = vld [vmem:[%s1402_s9 + $0x108] sm:$0xff]  ;;  %v206_v8 = vld [vmem:[%s1402_s9 + $0x110] sm:$0xff]  ;;  %p1269_p11 = scmp.ne.s32.totalorder %s1267_s30, %s1268_s4  ;;  %p1273_p0 = scmp.lt.s32.totalorder %s1267_s30, %s1901_s3 }
  0x17   : > { %454 = vmatpush.msra.mxu0 %v236_v2  ;;  %663 = vmatpush.msra.mxu1 %v237_v3  ;;  %v172_v5 = vld [vmem:[%s1402_s9] sm:$0xff]  ;;  %v173_v7 = vld [vmem:[%s1402_s9 + $0x8] sm:$0xff]  ;;  %v174_v9 = vld [vmem:[%s1402_s9 + $0x10] sm:$0xff]  ;;  %p1274_p1 = scmp.lt.s32.totalorder %s1272_s7, %s1268_s4 }
  0x18   : > { %1103 = vmatmul.msk.f32.vlgmr.msra.gmra.mxu2 %vm246_vm0, %v204_v4  ;;  %1167 = vmatmul.msk.f32.vlgmr.msra.gmra.mxu3 %vm246_vm0, %v204_v4  ;;  %v207_v10 = vld [vmem:[%s1402_s9 + $0x118] sm:$0xff]  ;;  %v208_v12 = vld [vmem:[%s1402_s9 + $0x120] sm:$0xff]  ;;  %v209_v14 = vld [vmem:[%s1402_s9 + $0x128] sm:$0xff]  ;;  %p1270_p12 = pnand %p1269_p11, %p1376_p5 }
  0x19   : > { %1071 = vmatmul.msk.f32.vlgmr.msra.gmra.mxu0 %vm246_vm0, %v172_v5  ;;  %1135 = vmatmul.msk.f32.vlgmr.msra.gmra.mxu1 %vm246_vm0, %v172_v5  ;;  %v175_v11 = vld [vmem:[%s1402_s9 + $0x18] sm:$0xff]  ;;  %v176_v13 = vld [vmem:[%s1402_s9 + $0x20] sm:$0xff]  ;;  %v177_v15 = vld [vmem:[%s1402_s9 + $0x28] sm:$0xff]  ;;  %p1275_p2 = por %p1274_p1, %p1273_p0 }
  0x1a   : > { %v210_v16 = vld [vmem:[%s1402_s9 + $0x130] sm:$0xff]  ;;  %v211_v18 = vld [vmem:[%s1402_s9 + $0x138] sm:$0xff]  ;;  %v212_v20 = vld [vmem:[%s1402_s9 + $0x140] sm:$0xff]  ;;  %p1271_p13 = pneg %p1270_p12 }
  0x1b   : > { %v178_v17 = vld [vmem:[%s1402_s9 + $0x30] sm:$0xff]  ;;  %v179_v19 = vld [vmem:[%s1402_s9 + $0x38] sm:$0xff]  ;;  %v180_v21 = vld [vmem:[%s1402_s9 + $0x40] sm:$0xff] }
  0x1c   : > { %v213_v22 = vld [vmem:[%s1402_s9 + $0x148] sm:$0xff]  ;;  %v214_v24 = vld [vmem:[%s1402_s9 + $0x150] sm:$0xff]  ;;  %v215_v26 = vld [vmem:[%s1402_s9 + $0x158] sm:$0xff]  ;;  %p1276_p3 = pnand %p1275_p2, %p1271_p13 }
  0x1d   : > { %v181_v23 = vld [vmem:[%s1402_s9 + $0x48] sm:$0xff]  ;;  %v182_v25 = vld [vmem:[%s1402_s9 + $0x50] sm:$0xff]  ;;  %v183_v27 = vld [vmem:[%s1402_s9 + $0x58] sm:$0xff] }
  0x1e   : > { %v216_v28 = vld [vmem:[%s1402_s9 + $0x160] sm:$0xff]  ;;  %v217_v30 = vld [vmem:[%s1402_s9 + $0x168] sm:$0xff]  ;;  %v218_v32 = vld [vmem:[%s1402_s9 + $0x170] sm:$0xff] }
  0x1f   : > { %v184_v29 = vld [vmem:[%s1402_s9 + $0x60] sm:$0xff]  ;;  %v185_v31 = vld [vmem:[%s1402_s9 + $0x68] sm:$0xff]  ;;  %v186_v33 = vld [vmem:[%s1402_s9 + $0x70] sm:$0xff] }
  0x20   : > { %1104 = vmatmul.msk.f32.gmra.mxu2 %vm246_vm0, %v205_v6  ;;  %1168 = vmatmul.msk.f32.gmra.mxu3 %vm246_vm0, %v205_v6  ;;  %v219_v34 = vld [vmem:[%s1402_s9 + $0x178] sm:$0xff]  ;;  %v220_v39 = vld [vmem:[%s1402_s9 + $0x180] sm:$0xff]  ;;  %v221_v49 = vld [vmem:[%s1402_s9 + $0x188] sm:$0xff] }
  0x21   : > { %1072 = vmatmul.msk.f32.gmra.mxu0 %vm246_vm0, %v173_v7  ;;  %1136 = vmatmul.msk.f32.gmra.mxu1 %vm246_vm0, %v173_v7  ;;  %v187_v35 = vld [vmem:[%s1402_s9 + $0x78] sm:$0xff]  ;;  %v188_v42 = vld [vmem:[%s1402_s9 + $0x80] sm:$0xff]  ;;  %v189_v52 = vld [vmem:[%s1402_s9 + $0x88] sm:$0xff] }
  0x22   : > { %v222_v59 = vld [vmem:[%s1402_s9 + $0x190] sm:$0xff]  ;;  %v223_v5 = vld [vmem:[%s1402_s9 + $0x198] sm:$0xff] }
  0x23   : > { %v190_v62 = vld [vmem:[%s1402_s9 + $0x90] sm:$0xff] }
  0x28   : > { %1105 = vmatmul.msk.f32.gmra.mxu2 %vm246_vm0, %v206_v8  ;;  %1169 = vmatmul.msk.f32.gmra.mxu3 %vm246_vm0, %v206_v8  ;;  %v191_v8 = vld [vmem:[%s1402_s9 + $0x98] sm:$0xff] }
  0x29   : > { %1073 = vmatmul.msk.f32.gmra.mxu0 %vm246_vm0, %v174_v9  ;;  %1137 = vmatmul.msk.f32.gmra.mxu1 %vm246_vm0, %v174_v9 }
  0x30   : > { %1106 = vmatmul.msk.f32.gmra.mxu2 %vm246_vm0, %v207_v10  ;;  %1170 = vmatmul.msk.f32.gmra.mxu3 %vm246_vm0, %v207_v10 }
  0x31   : > { %1074 = vmatmul.msk.f32.gmra.mxu0 %vm246_vm0, %v175_v11  ;;  %1138 = vmatmul.msk.f32.gmra.mxu1 %vm246_vm0, %v175_v11 }
  0x38   : > { %1107 = vmatmul.msk.f32.gmra.mxu2 %vm246_vm0, %v208_v12  ;;  %1171 = vmatmul.msk.f32.gmra.mxu3 %vm246_vm0, %v208_v12 }
  0x39   : > { %1075 = vmatmul.msk.f32.gmra.mxu0 %vm246_vm0, %v176_v13  ;;  %1139 = vmatmul.msk.f32.gmra.mxu1 %vm246_vm0, %v176_v13 }
  0x40   : > { %1108 = vmatmul.msk.f32.gmra.mxu2 %vm246_vm0, %v209_v14  ;;  %1172 = vmatmul.msk.f32.gmra.mxu3 %vm246_vm0, %v209_v14 }
  0x41   : > { %1076 = vmatmul.msk.f32.gmra.mxu0 %vm246_vm0, %v177_v15  ;;  %1140 = vmatmul.msk.f32.gmra.mxu1 %vm246_vm0, %v177_v15  ;;  %v224_v15 = vld [vmem:[%s1402_s9 + $0x1a0] sm:$0xff] }
  0x48   : > { %1109 = vmatmul.msk.f32.gmra.mxu2 %vm246_vm0, %v210_v16  ;;  %1173 = vmatmul.msk.f32.gmra.mxu3 %vm246_vm0, %v210_v16 }
  0x49   : > { %1077 = vmatmul.msk.f32.gmra.mxu0 %vm246_vm0, %v178_v17  ;;  %1141 = vmatmul.msk.f32.gmra.mxu1 %vm246_vm0, %v178_v17 }
  0x50   : > { %1110 = vmatmul.msk.f32.gmra.mxu2 %vm246_vm0, %v211_v18  ;;  %1174 = vmatmul.msk.f32.gmra.mxu3 %vm246_vm0, %v211_v18  ;;  %v192_v18 = vld [vmem:[%s1402_s9 + $0xa0] sm:$0xff] }
  0x51   : > { %1078 = vmatmul.msk.f32.gmra.mxu0 %vm246_vm0, %v179_v19  ;;  %1142 = vmatmul.msk.f32.gmra.mxu1 %vm246_vm0, %v179_v19 }
  0x58   : > { %1111 = vmatmul.msk.f32.gmra.mxu2 %vm246_vm0, %v212_v20  ;;  %1175 = vmatmul.msk.f32.gmra.mxu3 %vm246_vm0, %v212_v20 }
  0x59   : > { %1079 = vmatmul.msk.f32.gmra.mxu0 %vm246_vm0, %v180_v21  ;;  %1143 = vmatmul.msk.f32.gmra.mxu1 %vm246_vm0, %v180_v21 }
  0x60   : > { %1112 = vmatmul.msk.f32.gmra.mxu2 %vm246_vm0, %v213_v22  ;;  %1176 = vmatmul.msk.f32.gmra.mxu3 %vm246_vm0, %v213_v22 }
  0x61   : > { %1080 = vmatmul.msk.f32.gmra.mxu0 %vm246_vm0, %v181_v23  ;;  %1144 = vmatmul.msk.f32.gmra.mxu1 %vm246_vm0, %v181_v23 }
  0x68   : > { %1113 = vmatmul.msk.f32.gmra.mxu2 %vm246_vm0, %v214_v24  ;;  %1177 = vmatmul.msk.f32.gmra.mxu3 %vm246_vm0, %v214_v24 }
  0x69   : > { %1081 = vmatmul.msk.f32.gmra.mxu0 %vm246_vm0, %v182_v25  ;;  %1145 = vmatmul.msk.f32.gmra.mxu1 %vm246_vm0, %v182_v25  ;;  %v225_v25 = vld [vmem:[%s1402_s9 + $0x1a8] sm:$0xff] }
  0x70   : > { %1114 = vmatmul.msk.f32.gmra.mxu2 %vm246_vm0, %v215_v26  ;;  %1178 = vmatmul.msk.f32.gmra.mxu3 %vm246_vm0, %v215_v26 }
  0x71   : > { %1082 = vmatmul.msk.f32.gmra.mxu0 %vm246_vm0, %v183_v27  ;;  %1146 = vmatmul.msk.f32.gmra.mxu1 %vm246_vm0, %v183_v27 }
  0x78   : > { %1115 = vmatmul.msk.f32.gmra.mxu2 %vm246_vm0, %v216_v28  ;;  %1179 = vmatmul.msk.f32.gmra.mxu3 %vm246_vm0, %v216_v28  ;;  %v193_v28 = vld [vmem:[%s1402_s9 + $0xa8] sm:$0xff] }
  0x79   : > { %1083 = vmatmul.msk.f32.gmra.mxu0 %vm246_vm0, %v184_v29  ;;  %1147 = vmatmul.msk.f32.gmra.mxu1 %vm246_vm0, %v184_v29 }
  0x80   : > { %1116 = vmatmul.msk.f32.gmra.mxu2 %vm246_vm0, %v217_v30  ;;  %1180 = vmatmul.msk.f32.gmra.mxu3 %vm246_vm0, %v217_v30 }
  0x81   : > { %1084 = vmatmul.msk.f32.gmra.mxu0 %vm246_vm0, %v185_v31  ;;  %1148 = vmatmul.msk.f32.gmra.mxu1 %vm246_vm0, %v185_v31 }
  0x88   : > { %1117 = vmatmul.msk.f32.gmra.mxu2 %vm246_vm0, %v218_v32  ;;  %1181 = vmatmul.msk.f32.gmra.mxu3 %vm246_vm0, %v218_v32 }
  0x89   : > { %1085 = vmatmul.msk.f32.gmra.mxu0 %vm246_vm0, %v186_v33  ;;  %1149 = vmatmul.msk.f32.gmra.mxu1 %vm246_vm0, %v186_v33 }
  0x90   : > { %1118 = vmatmul.msk.f32.gmra.mxu2 %vm246_vm0, %v219_v34  ;;  %1182 = vmatmul.msk.f32.gmra.mxu3 %vm246_vm0, %v219_v34 }
  0x91   : > { %1086 = vmatmul.msk.f32.gmra.mxu0 %vm246_vm0, %v187_v35  ;;  %1150 = vmatmul.msk.f32.gmra.mxu1 %vm246_vm0, %v187_v35  ;;  %v226_v35 = vld [vmem:[%s1402_s9 + $0x1b0] sm:$0xff] }
  0x96   : > { %v456_v40 = vpop.f32.mrf.mxu0  ;;  %v665_v41 = vpop.f32.mrf.mxu1 }
  0x97   : > { %v457_v43 = vadd.f32 %v456_v40, %v1506_v37  ;;  %v666_v44 = vadd.f32 %v665_v41, %v1508_v38  ;;  %v194_v40 = vld [vmem:[%s1402_s9 + $0xb0] sm:$0xff] }
  0x98   : > { %1119 = vmatmul.msk.f32.gmra.mxu2 %vm246_vm0, %v220_v39  ;;  %1183 = vmatmul.msk.f32.gmra.mxu3 %vm246_vm0, %v220_v39 }
  0x99   : > { %857 = vst [vmem:[%s1516_s20] sm:$0xff] %v457_v43  ;;  %1087 = vmatmul.msk.f32.gmra.mxu0 %vm246_vm0, %v188_v42  ;;  %1151 = vmatmul.msk.f32.gmra.mxu1 %vm246_vm0, %v188_v42 }
  0x9a   : > { %858 = vst [vmem:[%s1516_s20 + $0x8] sm:$0xff] %v666_v44 }
  0x9b   : > { %v552_v45 = vpop.f32.mrf.mxu2  ;;  %v761_v46 = vpop.f32.mrf.mxu3 }
  0x9c   : > { %v553_v47 = vadd.f32 %v552_v45, %v1506_v37  ;;  %v762_v48 = vadd.f32 %v761_v46, %v1508_v38 }
  0x9e   : > { %921 = vst [vmem:[%s1516_s20 + $0x200] sm:$0xff] %v553_v47  ;;  %v459_v50 = vpop.f32.mrf.mxu0  ;;  %v668_v51 = vpop.f32.mrf.mxu1  ;;  %v227_v47 = vld [vmem:[%s1402_s9 + $0x1b8] sm:$0xff] }
  0x9f   : > { %922 = vst [vmem:[%s1516_s20 + $0x208] sm:$0xff] %v762_v48  ;;  %v460_v53 = vadd.f32 %v459_v50, %v1506_v37  ;;  %v669_v54 = vadd.f32 %v668_v51, %v1508_v38  ;;  %v195_v50 = vld [vmem:[%s1402_s9 + $0xb8] sm:$0xff] }
  0xa0   : > { %1120 = vmatmul.msk.f32.gmra.mxu2 %vm246_vm0, %v221_v49  ;;  %1184 = vmatmul.msk.f32.gmra.mxu3 %vm246_vm0, %v221_v49 }
  0xa1   : > { %859 = vst [vmem:[%s1516_s20 + $0x10] sm:$0xff] %v460_v53  ;;  %1088 = vmatmul.msk.f32.gmra.mxu0 %vm246_vm0, %v189_v52  ;;  %1152 = vmatmul.msk.f32.gmra.mxu1 %vm246_vm0, %v189_v52 }
  0xa2   : > { %860 = vst [vmem:[%s1516_s20 + $0x18] sm:$0xff] %v669_v54 }
  0xa3   : > { %v555_v55 = vpop.f32.mrf.mxu2  ;;  %v764_v56 = vpop.f32.mrf.mxu3 }
  0xa4   : > { %v556_v57 = vadd.f32 %v555_v55, %v1506_v37  ;;  %v765_v58 = vadd.f32 %v764_v56, %v1508_v38 }
  0xa6   : > { %923 = vst [vmem:[%s1516_s20 + $0x210] sm:$0xff] %v556_v57  ;;  %v462_v60 = vpop.f32.mrf.mxu0  ;;  %v671_v61 = vpop.f32.mrf.mxu1  ;;  %v228_v57 = vld [vmem:[%s1402_s9 + $0x1c0] sm:$0xff] }
  0xa7   : > { %924 = vst [vmem:[%s1516_s20 + $0x218] sm:$0xff] %v765_v58  ;;  %v463_v63 = vadd.f32 %v462_v60, %v1506_v37  ;;  %v672_v0 = vadd.f32 %v671_v61, %v1508_v38  ;;  %v196_v60 = vld [vmem:[%s1402_s9 + $0xc0] sm:$0xff] }
  0xa8   : > { %1121 = vmatmul.msk.f32.gmra.mxu2 %vm246_vm0, %v222_v59  ;;  %1185 = vmatmul.msk.f32.gmra.mxu3 %vm246_vm0, %v222_v59 }
  0xa9   : > { %861 = vst [vmem:[%s1516_s20 + $0x20] sm:$0xff] %v463_v63  ;;  %1089 = vmatmul.msk.f32.gmra.mxu0 %vm246_vm0, %v190_v62  ;;  %1153 = vmatmul.msk.f32.gmra.mxu1 %vm246_vm0, %v190_v62 }
  0xaa   : > { %862 = vst [vmem:[%s1516_s20 + $0x28] sm:$0xff] %v672_v0 }
  0xab   : > { %v558_v1 = vpop.f32.mrf.mxu2  ;;  %v767_v2 = vpop.f32.mrf.mxu3 }
  0xac   : > { %v559_v3 = vadd.f32 %v558_v1, %v1506_v37  ;;  %v768_v4 = vadd.f32 %v767_v2, %v1508_v38 }
  0xae   : > { %925 = vst [vmem:[%s1516_s20 + $0x220] sm:$0xff] %v559_v3  ;;  %v465_v6 = vpop.f32.mrf.mxu0  ;;  %v674_v7 = vpop.f32.mrf.mxu1  ;;  %v229_v3 = vld [vmem:[%s1402_s9 + $0x1c8] sm:$0xff] }
  0xaf   : > { %926 = vst [vmem:[%s1516_s20 + $0x228] sm:$0xff] %v768_v4  ;;  %v466_v9 = vadd.f32 %v465_v6, %v1506_v37  ;;  %v675_v10 = vadd.f32 %v674_v7, %v1508_v38  ;;  %v197_v6 = vld [vmem:[%s1402_s9 + $0xc8] sm:$0xff] }
  0xb0   : > { %1122 = vmatmul.msk.f32.gmra.mxu2 %vm246_vm0, %v223_v5  ;;  %1186 = vmatmul.msk.f32.gmra.mxu3 %vm246_vm0, %v223_v5 }
  0xb1   : > { %863 = vst [vmem:[%s1516_s20 + $0x30] sm:$0xff] %v466_v9  ;;  %1090 = vmatmul.msk.f32.gmra.mxu0 %vm246_vm0, %v191_v8  ;;  %1154 = vmatmul.msk.f32.gmra.mxu1 %vm246_vm0, %v191_v8 }
  0xb2   : > { %864 = vst [vmem:[%s1516_s20 + $0x38] sm:$0xff] %v675_v10 }
  0xb3   : > { %v561_v11 = vpop.f32.mrf.mxu2  ;;  %v770_v12 = vpop.f32.mrf.mxu3 }
  0xb4   : > { %v562_v13 = vadd.f32 %v561_v11, %v1506_v37  ;;  %v771_v14 = vadd.f32 %v770_v12, %v1508_v38 }
  0xb6   : > { %927 = vst [vmem:[%s1516_s20 + $0x230] sm:$0xff] %v562_v13  ;;  %v468_v16 = vpop.f32.mrf.mxu0  ;;  %v677_v17 = vpop.f32.mrf.mxu1  ;;  %v230_v13 = vld [vmem:[%s1402_s9 + $0x1d0] sm:$0xff] }
  0xb7   : > { %928 = vst [vmem:[%s1516_s20 + $0x238] sm:$0xff] %v771_v14  ;;  %v469_v19 = vadd.f32 %v468_v16, %v1506_v37  ;;  %v678_v20 = vadd.f32 %v677_v17, %v1508_v38  ;;  %v198_v16 = vld [vmem:[%s1402_s9 + $0xd0] sm:$0xff] }
  0xb8   : > { %1123 = vmatmul.msk.f32.gmra.mxu2 %vm246_vm0, %v224_v15  ;;  %1187 = vmatmul.msk.f32.gmra.mxu3 %vm246_vm0, %v224_v15 }
  0xb9   : > { %865 = vst [vmem:[%s1516_s20 + $0x40] sm:$0xff] %v469_v19  ;;  %1091 = vmatmul.msk.f32.gmra.mxu0 %vm246_vm0, %v192_v18  ;;  %1155 = vmatmul.msk.f32.gmra.mxu1 %vm246_vm0, %v192_v18 }
  0xba   : > { %866 = vst [vmem:[%s1516_s20 + $0x48] sm:$0xff] %v678_v20 }
  0xbb   : > { %v564_v21 = vpop.f32.mrf.mxu2  ;;  %v773_v22 = vpop.f32.mrf.mxu3 }
  0xbc   : > { %v565_v23 = vadd.f32 %v564_v21, %v1506_v37  ;;  %v774_v24 = vadd.f32 %v773_v22, %v1508_v38 }
  0xbe   : > { %929 = vst [vmem:[%s1516_s20 + $0x240] sm:$0xff] %v565_v23  ;;  %v471_v26 = vpop.f32.mrf.mxu0  ;;  %v680_v27 = vpop.f32.mrf.mxu1  ;;  %v231_v23 = vld [vmem:[%s1402_s9 + $0x1d8] sm:$0xff] }
  0xbf   : > { %930 = vst [vmem:[%s1516_s20 + $0x248] sm:$0xff] %v774_v24  ;;  %v472_v29 = vadd.f32 %v471_v26, %v1506_v37  ;;  %v681_v30 = vadd.f32 %v680_v27, %v1508_v38  ;;  %v199_v26 = vld [vmem:[%s1402_s9 + $0xd8] sm:$0xff] }
  0xc0   : > { %1124 = vmatmul.msk.f32.gmra.mxu2 %vm246_vm0, %v225_v25  ;;  %1188 = vmatmul.msk.f32.gmra.mxu3 %vm246_vm0, %v225_v25 }
  0xc1   : > { %867 = vst [vmem:[%s1516_s20 + $0x50] sm:$0xff] %v472_v29  ;;  %1092 = vmatmul.msk.f32.gmra.mxu0 %vm246_vm0, %v193_v28  ;;  %1156 = vmatmul.msk.f32.gmra.mxu1 %vm246_vm0, %v193_v28 }
  0xc2   : > { %868 = vst [vmem:[%s1516_s20 + $0x58] sm:$0xff] %v681_v30 }
  0xc3   : > { %v567_v31 = vpop.f32.mrf.mxu2  ;;  %v776_v32 = vpop.f32.mrf.mxu3 }
  0xc4   : > { %v568_v33 = vadd.f32 %v567_v31, %v1506_v37  ;;  %v777_v34 = vadd.f32 %v776_v32, %v1508_v38 }
  0xc6   : > { %931 = vst [vmem:[%s1516_s20 + $0x250] sm:$0xff] %v568_v33  ;;  %v474_v36 = vpop.f32.mrf.mxu0  ;;  %v683_v39 = vpop.f32.mrf.mxu1  ;;  %v232_v33 = vld [vmem:[%s1402_s9 + $0x1e0] sm:$0xff] }
  0xc7   : > { %932 = vst [vmem:[%s1516_s20 + $0x258] sm:$0xff] %v777_v34  ;;  %v475_v41 = vadd.f32 %v474_v36, %v1506_v37  ;;  %v684_v42 = vadd.f32 %v683_v39, %v1508_v38  ;;  %v200_v36 = vld [vmem:[%s1402_s9 + $0xe0] sm:$0xff] }
  0xc8   : > { %1125 = vmatmul.msk.f32.gmra.mxu2 %vm246_vm0, %v226_v35  ;;  %1189 = vmatmul.msk.f32.gmra.mxu3 %vm246_vm0, %v226_v35 }
  0xc9   : > { %869 = vst [vmem:[%s1516_s20 + $0x60] sm:$0xff] %v475_v41  ;;  %1093 = vmatmul.msk.f32.gmra.mxu0 %vm246_vm0, %v194_v40  ;;  %1157 = vmatmul.msk.f32.gmra.mxu1 %vm246_vm0, %v194_v40 }
  0xca   : > { %870 = vst [vmem:[%s1516_s20 + $0x68] sm:$0xff] %v684_v42 }
  0xcb   : > { %v570_v43 = vpop.f32.mrf.mxu2  ;;  %v779_v44 = vpop.f32.mrf.mxu3 }
  0xcc   : > { %v571_v45 = vadd.f32 %v570_v43, %v1506_v37  ;;  %v780_v46 = vadd.f32 %v779_v44, %v1508_v38 }
  0xce   : > { %933 = vst [vmem:[%s1516_s20 + $0x260] sm:$0xff] %v571_v45  ;;  %v477_v48 = vpop.f32.mrf.mxu0  ;;  %v686_v49 = vpop.f32.mrf.mxu1  ;;  %v233_v45 = vld [vmem:[%s1402_s9 + $0x1e8] sm:$0xff] }
  0xcf   : > { %934 = vst [vmem:[%s1516_s20 + $0x268] sm:$0xff] %v780_v46  ;;  %v478_v51 = vadd.f32 %v477_v48, %v1506_v37  ;;  %v687_v52 = vadd.f32 %v686_v49, %v1508_v38  ;;  %v201_v48 = vld [vmem:[%s1402_s9 + $0xe8] sm:$0xff] }
  0xd0   : > { %1126 = vmatmul.msk.f32.gmra.mxu2 %vm246_vm0, %v227_v47  ;;  %1190 = vmatmul.msk.f32.gmra.mxu3 %vm246_vm0, %v227_v47 }
  0xd1   : > { %871 = vst [vmem:[%s1516_s20 + $0x70] sm:$0xff] %v478_v51  ;;  %1094 = vmatmul.msk.f32.gmra.mxu0 %vm246_vm0, %v195_v50  ;;  %1158 = vmatmul.msk.f32.gmra.mxu1 %vm246_vm0, %v195_v50 }
  0xd2   : > { %872 = vst [vmem:[%s1516_s20 + $0x78] sm:$0xff] %v687_v52 }
  0xd3   : > { %v573_v53 = vpop.f32.mrf.mxu2  ;;  %v782_v54 = vpop.f32.mrf.mxu3 }
  0xd4   : > { %v574_v55 = vadd.f32 %v573_v53, %v1506_v37  ;;  %v783_v56 = vadd.f32 %v782_v54, %v1508_v38 }
  0xd6   : > { %935 = vst [vmem:[%s1516_s20 + $0x270] sm:$0xff] %v574_v55  ;;  %v480_v58 = vpop.f32.mrf.mxu0  ;;  %v689_v59 = vpop.f32.mrf.mxu1  ;;  %v234_v55 = vld [vmem:[%s1402_s9 + $0x1f0] sm:$0xff] }
  0xd7   : > { %936 = vst [vmem:[%s1516_s20 + $0x278] sm:$0xff] %v783_v56  ;;  %v481_v61 = vadd.f32 %v480_v58, %v1506_v37  ;;  %v690_v62 = vadd.f32 %v689_v59, %v1508_v38  ;;  %v202_v58 = vld [vmem:[%s1402_s9 + $0xf0] sm:$0xff] }
  0xd8   : > { %1127 = vmatmul.msk.f32.gmra.mxu2 %vm246_vm0, %v228_v57  ;;  %1191 = vmatmul.msk.f32.gmra.mxu3 %vm246_vm0, %v228_v57 }
  0xd9   : > { %873 = vst [vmem:[%s1516_s20 + $0x80] sm:$0xff] %v481_v61  ;;  %1095 = vmatmul.msk.f32.gmra.mxu0 %vm246_vm0, %v196_v60  ;;  %1159 = vmatmul.msk.f32.gmra.mxu1 %vm246_vm0, %v196_v60 }
  0xda   : > { %874 = vst [vmem:[%s1516_s20 + $0x88] sm:$0xff] %v690_v62 }
  0xdb   : > { %v576_v63 = vpop.f32.mrf.mxu2  ;;  %v785_v0 = vpop.f32.mrf.mxu3 }
  0xdc   : > { %v577_v1 = vadd.f32 %v576_v63, %v1506_v37  ;;  %v786_v2 = vadd.f32 %v785_v0, %v1508_v38 }
  0xde   : > { %937 = vst [vmem:[%s1516_s20 + $0x280] sm:$0xff] %v577_v1  ;;  %v483_v4 = vpop.f32.mrf.mxu0  ;;  %v692_v5 = vpop.f32.mrf.mxu1  ;;  %v235_v1 = vld [vmem:[%s1402_s9 + $0x1f8] sm:$0xff] }
  0xdf   : > { %938 = vst [vmem:[%s1516_s20 + $0x288] sm:$0xff] %v786_v2  ;;  %v484_v7 = vadd.f32 %v483_v4, %v1506_v37  ;;  %v693_v8 = vadd.f32 %v692_v5, %v1508_v38  ;;  %v203_v4 = vld [vmem:[%s1402_s9 + $0xf8] sm:$0xff] }
  0xe0   : > { %1128 = vmatmul.msk.f32.gmra.mxu2 %vm246_vm0, %v229_v3  ;;  %1192 = vmatmul.msk.f32.gmra.mxu3 %vm246_vm0, %v229_v3 }
  0xe1   : > { %875 = vst [vmem:[%s1516_s20 + $0x90] sm:$0xff] %v484_v7  ;;  %1096 = vmatmul.msk.f32.gmra.mxu0 %vm246_vm0, %v197_v6  ;;  %1160 = vmatmul.msk.f32.gmra.mxu1 %vm246_vm0, %v197_v6 }
  0xe2   : > { %876 = vst [vmem:[%s1516_s20 + $0x98] sm:$0xff] %v693_v8 }
  0xe3   : > { %v579_v9 = vpop.f32.mrf.mxu2  ;;  %v788_v10 = vpop.f32.mrf.mxu3 }
  0xe4   : > { %v580_v11 = vadd.f32 %v579_v9, %v1506_v37  ;;  %v789_v12 = vadd.f32 %v788_v10, %v1508_v38 }
  0xe6   : > { %939 = vst [vmem:[%s1516_s20 + $0x290] sm:$0xff] %v580_v11  ;;  %v486_v14 = vpop.f32.mrf.mxu0  ;;  %v695_v15 = vpop.f32.mrf.mxu1 }
  0xe7   : > { %940 = vst [vmem:[%s1516_s20 + $0x298] sm:$0xff] %v789_v12  ;;  %v487_v17 = vadd.f32 %v486_v14, %v1506_v37  ;;  %v696_v18 = vadd.f32 %v695_v15, %v1508_v38 }
  0xe8   : > { %1129 = vmatmul.msk.f32.gmra.mxu2 %vm246_vm0, %v230_v13  ;;  %1193 = vmatmul.msk.f32.gmra.mxu3 %vm246_vm0, %v230_v13 }
  0xe9   : > { %877 = vst [vmem:[%s1516_s20 + $0xa0] sm:$0xff] %v487_v17  ;;  %1097 = vmatmul.msk.f32.gmra.mxu0 %vm246_vm0, %v198_v16  ;;  %1161 = vmatmul.msk.f32.gmra.mxu1 %vm246_vm0, %v198_v16 }
  0xea   : > { %878 = vst [vmem:[%s1516_s20 + $0xa8] sm:$0xff] %v696_v18 }
  0xeb   : > { %v582_v19 = vpop.f32.mrf.mxu2  ;;  %v791_v20 = vpop.f32.mrf.mxu3 }
  0xec   : > { %v583_v21 = vadd.f32 %v582_v19, %v1506_v37  ;;  %v792_v22 = vadd.f32 %v791_v20, %v1508_v38 }
  0xee   : > { %941 = vst [vmem:[%s1516_s20 + $0x2a0] sm:$0xff] %v583_v21  ;;  %v489_v24 = vpop.f32.mrf.mxu0  ;;  %v698_v25 = vpop.f32.mrf.mxu1 }
  0xef   : > { %942 = vst [vmem:[%s1516_s20 + $0x2a8] sm:$0xff] %v792_v22  ;;  %v490_v27 = vadd.f32 %v489_v24, %v1506_v37  ;;  %v699_v28 = vadd.f32 %v698_v25, %v1508_v38 }
  0xf0   : > { %1130 = vmatmul.msk.f32.gmra.mxu2 %vm246_vm0, %v231_v23  ;;  %1194 = vmatmul.msk.f32.gmra.mxu3 %vm246_vm0, %v231_v23 }
  0xf1   : > { %879 = vst [vmem:[%s1516_s20 + $0xb0] sm:$0xff] %v490_v27  ;;  %1098 = vmatmul.msk.f32.gmra.mxu0 %vm246_vm0, %v199_v26  ;;  %1162 = vmatmul.msk.f32.gmra.mxu1 %vm246_vm0, %v199_v26 }
  0xf2   : > { %880 = vst [vmem:[%s1516_s20 + $0xb8] sm:$0xff] %v699_v28 }
  0xf3   : > { %v585_v29 = vpop.f32.mrf.mxu2  ;;  %v794_v30 = vpop.f32.mrf.mxu3 }
  0xf4   : > { %v586_v31 = vadd.f32 %v585_v29, %v1506_v37  ;;  %v795_v32 = vadd.f32 %v794_v30, %v1508_v38 }
  0xf6   : > { %943 = vst [vmem:[%s1516_s20 + $0x2b0] sm:$0xff] %v586_v31  ;;  %v492_v34 = vpop.f32.mrf.mxu0  ;;  %v701_v35 = vpop.f32.mrf.mxu1 }
  0xf7   : > { %944 = vst [vmem:[%s1516_s20 + $0x2b8] sm:$0xff] %v795_v32  ;;  %v493_v39 = vadd.f32 %v492_v34, %v1506_v37  ;;  %v702_v40 = vadd.f32 %v701_v35, %v1508_v38 }
  0xf8   : > { %1131 = vmatmul.msk.f32.gmra.mxu2 %vm246_vm0, %v232_v33  ;;  %1195 = vmatmul.msk.f32.gmra.mxu3 %vm246_vm0, %v232_v33 }
  0xf9   : > { %881 = vst [vmem:[%s1516_s20 + $0xc0] sm:$0xff] %v493_v39  ;;  %1099 = vmatmul.msk.f32.gmra.mxu0 %vm246_vm0, %v200_v36  ;;  %1163 = vmatmul.msk.f32.gmra.mxu1 %vm246_vm0, %v200_v36 }
  0xfa   : > { %882 = vst [vmem:[%s1516_s20 + $0xc8] sm:$0xff] %v702_v40 }
  0xfb   : > { %v588_v41 = vpop.f32.mrf.mxu2  ;;  %v797_v42 = vpop.f32.mrf.mxu3 }
  0xfc   : > { %v589_v43 = vadd.f32 %v588_v41, %v1506_v37  ;;  %v798_v44 = vadd.f32 %v797_v42, %v1508_v38 }
  0xfe   : > { %945 = vst [vmem:[%s1516_s20 + $0x2c0] sm:$0xff] %v589_v43  ;;  %v495_v46 = vpop.f32.mrf.mxu0  ;;  %v704_v47 = vpop.f32.mrf.mxu1 }
  0xff   : > { %946 = vst [vmem:[%s1516_s20 + $0x2c8] sm:$0xff] %v798_v44  ;;  %v496_v49 = vadd.f32 %v495_v46, %v1506_v37  ;;  %v705_v50 = vadd.f32 %v704_v47, %v1508_v38 }
 0x100   : > { %1132 = vmatmul.msk.f32.gmra.mxu2 %vm246_vm0, %v233_v45  ;;  %1196 = vmatmul.msk.f32.gmra.mxu3 %vm246_vm0, %v233_v45 }
 0x101   : > { %883 = vst [vmem:[%s1516_s20 + $0xd0] sm:$0xff] %v496_v49  ;;  %1100 = vmatmul.msk.f32.gmra.mxu0 %vm246_vm0, %v201_v48  ;;  %1164 = vmatmul.msk.f32.gmra.mxu1 %vm246_vm0, %v201_v48 }
 0x102   : > { %884 = vst [vmem:[%s1516_s20 + $0xd8] sm:$0xff] %v705_v50 }
 0x103   : > { %v591_v51 = vpop.f32.mrf.mxu2  ;;  %v800_v52 = vpop.f32.mrf.mxu3 }
 0x104   : > { %v592_v53 = vadd.f32 %v591_v51, %v1506_v37  ;;  %v801_v54 = vadd.f32 %v800_v52, %v1508_v38 }
 0x106   : > { %947 = vst [vmem:[%s1516_s20 + $0x2d0] sm:$0xff] %v592_v53  ;;  %v498_v56 = vpop.f32.mrf.mxu0  ;;  %v707_v57 = vpop.f32.mrf.mxu1 }
 0x107   : > { %948 = vst [vmem:[%s1516_s20 + $0x2d8] sm:$0xff] %v801_v54  ;;  %v499_v59 = vadd.f32 %v498_v56, %v1506_v37  ;;  %v708_v60 = vadd.f32 %v707_v57, %v1508_v38 }
 0x108   : > { %1133 = vmatmul.msk.f32.gmra.mxu2 %vm246_vm0, %v234_v55  ;;  %1197 = vmatmul.msk.f32.gmra.mxu3 %vm246_vm0, %v234_v55 }
 0x109   : > { %885 = vst [vmem:[%s1516_s20 + $0xe0] sm:$0xff] %v499_v59  ;;  %1101 = vmatmul.msk.f32.gmra.mxu0 %vm246_vm0, %v202_v58  ;;  %1165 = vmatmul.msk.f32.gmra.mxu1 %vm246_vm0, %v202_v58 }
 0x10a   : > { %886 = vst [vmem:[%s1516_s20 + $0xe8] sm:$0xff] %v708_v60 }
 0x10b   : > { %v594_v61 = vpop.f32.mrf.mxu2  ;;  %v803_v62 = vpop.f32.mrf.mxu3 }
 0x10c   : > { %v595_v63 = vadd.f32 %v594_v61, %v1506_v37  ;;  %v804_v0 = vadd.f32 %v803_v62, %v1508_v38 }
 0x10e   : > { %949 = vst [vmem:[%s1516_s20 + $0x2e0] sm:$0xff] %v595_v63  ;;  %v501_v2 = vpop.f32.mrf.mxu0  ;;  %v710_v3 = vpop.f32.mrf.mxu1 }
 0x10f   : > { %950 = vst [vmem:[%s1516_s20 + $0x2e8] sm:$0xff] %v804_v0  ;;  %v502_v5 = vadd.f32 %v501_v2, %v1506_v37  ;;  %v711_v6 = vadd.f32 %v710_v3, %v1508_v38 }
 0x110   : > { %1134 = vmatmul.msk.f32.gmra.mxu2 %vm246_vm0, %v235_v1  ;;  %1198 = vmatmul.msk.f32.gmra.mxu3 %vm246_vm0, %v235_v1 }
 0x111   : > { %887 = vst [vmem:[%s1516_s20 + $0xf0] sm:$0xff] %v502_v5  ;;  %1102 = vmatmul.msk.f32.gmra.mxu0 %vm246_vm0, %v203_v4  ;;  %1166 = vmatmul.msk.f32.gmra.mxu1 %vm246_vm0, %v203_v4 }
 0x112   : > { %888 = vst [vmem:[%s1516_s20 + $0xf8] sm:$0xff] %v711_v6 }
 0x113   : > { %v597_v7 = vpop.f32.mrf.mxu2  ;;  %v806_v8 = vpop.f32.mrf.mxu3 }
 0x114   : > { %v598_v9 = vadd.f32 %v597_v7, %v1506_v37  ;;  %v807_v10 = vadd.f32 %v806_v8, %v1508_v38 }
 0x116   : > { %951 = vst [vmem:[%s1516_s20 + $0x2f0] sm:$0xff] %v598_v9  ;;  %v504_v11 = vpop.f32.mrf.mxu0  ;;  %v713_v12 = vpop.f32.mrf.mxu1 }
 0x117   : > { %952 = vst [vmem:[%s1516_s20 + $0x2f8] sm:$0xff] %v807_v10  ;;  %v505_v13 = vadd.f32 %v504_v11, %v1506_v37  ;;  %v714_v14 = vadd.f32 %v713_v12, %v1508_v38 }
 0x119   : > { %889 = vst [vmem:[%s1516_s20 + $0x100] sm:$0xff] %v505_v13 }
 0x11a   : > { %890 = vst [vmem:[%s1516_s20 + $0x108] sm:$0xff] %v714_v14 }
 0x11b   : > { %v600_v15 = vpop.f32.mrf.mxu2  ;;  %v809_v16 = vpop.f32.mrf.mxu3 }
 0x11c   : > { %v601_v17 = vadd.f32 %v600_v15, %v1506_v37  ;;  %v810_v18 = vadd.f32 %v809_v16, %v1508_v38 }
 0x11e   : > { %953 = vst [vmem:[%s1516_s20 + $0x300] sm:$0xff] %v601_v17  ;;  %v507_v19 = vpop.f32.mrf.mxu0  ;;  %v716_v20 = vpop.f32.mrf.mxu1 }
 0x11f   : > { %954 = vst [vmem:[%s1516_s20 + $0x308] sm:$0xff] %v810_v18  ;;  %v508_v21 = vadd.f32 %v507_v19, %v1506_v37  ;;  %v717_v22 = vadd.f32 %v716_v20, %v1508_v38 }
 0x121   : > { %891 = vst [vmem:[%s1516_s20 + $0x110] sm:$0xff] %v508_v21 }
 0x122   : > { %892 = vst [vmem:[%s1516_s20 + $0x118] sm:$0xff] %v717_v22 }
 0x123   : > { %v603_v23 = vpop.f32.mrf.mxu2  ;;  %v812_v24 = vpop.f32.mrf.mxu3 }
 0x124   : > { %v604_v25 = vadd.f32 %v603_v23, %v1506_v37  ;;  %v813_v26 = vadd.f32 %v812_v24, %v1508_v38 }
 0x126   : > { %955 = vst [vmem:[%s1516_s20 + $0x310] sm:$0xff] %v604_v25  ;;  %v510_v27 = vpop.f32.mrf.mxu0  ;;  %v719_v28 = vpop.f32.mrf.mxu1 }
 0x127   : > { %956 = vst [vmem:[%s1516_s20 + $0x318] sm:$0xff] %v813_v26  ;;  %v511_v29 = vadd.f32 %v510_v27, %v1506_v37  ;;  %v720_v30 = vadd.f32 %v719_v28, %v1508_v38 }
 0x129   : > { %893 = vst [vmem:[%s1516_s20 + $0x120] sm:$0xff] %v511_v29 }
 0x12a   : > { %894 = vst [vmem:[%s1516_s20 + $0x128] sm:$0xff] %v720_v30 }
 0x12b   : > { %v606_v31 = vpop.f32.mrf.mxu2  ;;  %v815_v32 = vpop.f32.mrf.mxu3 }
 0x12c   : > { %v607_v33 = vadd.f32 %v606_v31, %v1506_v37  ;;  %v816_v34 = vadd.f32 %v815_v32, %v1508_v38 }
 0x12e   : > { %957 = vst [vmem:[%s1516_s20 + $0x320] sm:$0xff] %v607_v33  ;;  %v513_v35 = vpop.f32.mrf.mxu0  ;;  %v722_v36 = vpop.f32.mrf.mxu1 }
 0x12f   : > { %958 = vst [vmem:[%s1516_s20 + $0x328] sm:$0xff] %v816_v34  ;;  %v514_v39 = vadd.f32 %v513_v35, %v1506_v37  ;;  %v723_v40 = vadd.f32 %v722_v36, %v1508_v38 }
 0x131   : > { %895 = vst [vmem:[%s1516_s20 + $0x130] sm:$0xff] %v514_v39 }
 0x132   : > { %896 = vst [vmem:[%s1516_s20 + $0x138] sm:$0xff] %v723_v40 }
 0x133   : > { %v609_v41 = vpop.f32.mrf.mxu2  ;;  %v818_v42 = vpop.f32.mrf.mxu3 }
 0x134   : > { %v610_v43 = vadd.f32 %v609_v41, %v1506_v37  ;;  %v819_v44 = vadd.f32 %v818_v42, %v1508_v38 }
 0x136   : > { %959 = vst [vmem:[%s1516_s20 + $0x330] sm:$0xff] %v610_v43  ;;  %v516_v45 = vpop.f32.mrf.mxu0  ;;  %v725_v46 = vpop.f32.mrf.mxu1 }
 0x137   : > { %960 = vst [vmem:[%s1516_s20 + $0x338] sm:$0xff] %v819_v44  ;;  %v517_v47 = vadd.f32 %v516_v45, %v1506_v37  ;;  %v726_v48 = vadd.f32 %v725_v46, %v1508_v38 }
 0x139   : > { %897 = vst [vmem:[%s1516_s20 + $0x140] sm:$0xff] %v517_v47 }
 0x13a   : > { %898 = vst [vmem:[%s1516_s20 + $0x148] sm:$0xff] %v726_v48 }
 0x13b   : > { %v612_v49 = vpop.f32.mrf.mxu2  ;;  %v821_v50 = vpop.f32.mrf.mxu3 }
 0x13c   : > { %v613_v51 = vadd.f32 %v612_v49, %v1506_v37  ;;  %v822_v52 = vadd.f32 %v821_v50, %v1508_v38 }
 0x13e   : > { %961 = vst [vmem:[%s1516_s20 + $0x340] sm:$0xff] %v613_v51  ;;  %v519_v53 = vpop.f32.mrf.mxu0  ;;  %v728_v54 = vpop.f32.mrf.mxu1 }
 0x13f   : > { %962 = vst [vmem:[%s1516_s20 + $0x348] sm:$0xff] %v822_v52  ;;  %v520_v55 = vadd.f32 %v519_v53, %v1506_v37  ;;  %v729_v56 = vadd.f32 %v728_v54, %v1508_v38 }
 0x141   : > { %899 = vst [vmem:[%s1516_s20 + $0x150] sm:$0xff] %v520_v55 }
 0x142   : > { %900 = vst [vmem:[%s1516_s20 + $0x158] sm:$0xff] %v729_v56 }
 0x143   : > { %v615_v57 = vpop.f32.mrf.mxu2  ;;  %v824_v58 = vpop.f32.mrf.mxu3 }
 0x144   : > { %v616_v59 = vadd.f32 %v615_v57, %v1506_v37  ;;  %v825_v60 = vadd.f32 %v824_v58, %v1508_v38 }
 0x146   : > { %963 = vst [vmem:[%s1516_s20 + $0x350] sm:$0xff] %v616_v59  ;;  %v522_v61 = vpop.f32.mrf.mxu0  ;;  %v731_v62 = vpop.f32.mrf.mxu1 }
 0x147   : > { %964 = vst [vmem:[%s1516_s20 + $0x358] sm:$0xff] %v825_v60  ;;  %v523_v63 = vadd.f32 %v522_v61, %v1506_v37  ;;  %v732_v0 = vadd.f32 %v731_v62, %v1508_v38 }
 0x149   : > { %901 = vst [vmem:[%s1516_s20 + $0x160] sm:$0xff] %v523_v63 }
 0x14a   : > { %902 = vst [vmem:[%s1516_s20 + $0x168] sm:$0xff] %v732_v0 }
 0x14b   : > { %v618_v1 = vpop.f32.mrf.mxu2  ;;  %v827_v2 = vpop.f32.mrf.mxu3 }
 0x14c   : > { %v619_v3 = vadd.f32 %v618_v1, %v1506_v37  ;;  %v828_v4 = vadd.f32 %v827_v2, %v1508_v38 }
 0x14e   : > { %965 = vst [vmem:[%s1516_s20 + $0x360] sm:$0xff] %v619_v3  ;;  %v525_v5 = vpop.f32.mrf.mxu0  ;;  %v734_v6 = vpop.f32.mrf.mxu1 }
 0x14f   : > { %966 = vst [vmem:[%s1516_s20 + $0x368] sm:$0xff] %v828_v4  ;;  %v526_v7 = vadd.f32 %v525_v5, %v1506_v37  ;;  %v735_v8 = vadd.f32 %v734_v6, %v1508_v38 }
 0x151   : > { %903 = vst [vmem:[%s1516_s20 + $0x170] sm:$0xff] %v526_v7 }
 0x152   : > { %904 = vst [vmem:[%s1516_s20 + $0x178] sm:$0xff] %v735_v8 }
 0x153   : > { %v621_v9 = vpop.f32.mrf.mxu2  ;;  %v830_v10 = vpop.f32.mrf.mxu3 }
 0x154   : > { %v622_v11 = vadd.f32 %v621_v9, %v1506_v37  ;;  %v831_v12 = vadd.f32 %v830_v10, %v1508_v38 }
 0x156   : > { %967 = vst [vmem:[%s1516_s20 + $0x370] sm:$0xff] %v622_v11  ;;  %v528_v13 = vpop.f32.mrf.mxu0  ;;  %v737_v14 = vpop.f32.mrf.mxu1 }
 0x157   : > { %968 = vst [vmem:[%s1516_s20 + $0x378] sm:$0xff] %v831_v12  ;;  %v529_v15 = vadd.f32 %v528_v13, %v1506_v37  ;;  %v738_v16 = vadd.f32 %v737_v14, %v1508_v38 }
 0x159   : > { %905 = vst [vmem:[%s1516_s20 + $0x180] sm:$0xff] %v529_v15 }
 0x15a   : > { %906 = vst [vmem:[%s1516_s20 + $0x188] sm:$0xff] %v738_v16 }
 0x15b   : > { %v624_v17 = vpop.f32.mrf.mxu2  ;;  %v833_v18 = vpop.f32.mrf.mxu3 }
 0x15c   : > { %v625_v19 = vadd.f32 %v624_v17, %v1506_v37  ;;  %v834_v20 = vadd.f32 %v833_v18, %v1508_v38 }
 0x15e   : > { %969 = vst [vmem:[%s1516_s20 + $0x380] sm:$0xff] %v625_v19  ;;  %v531_v21 = vpop.f32.mrf.mxu0  ;;  %v740_v22 = vpop.f32.mrf.mxu1 }
 0x15f   : > { %970 = vst [vmem:[%s1516_s20 + $0x388] sm:$0xff] %v834_v20  ;;  %v532_v23 = vadd.f32 %v531_v21, %v1506_v37  ;;  %v741_v24 = vadd.f32 %v740_v22, %v1508_v38 }
 0x161   : > { %907 = vst [vmem:[%s1516_s20 + $0x190] sm:$0xff] %v532_v23 }
 0x162   : > { %908 = vst [vmem:[%s1516_s20 + $0x198] sm:$0xff] %v741_v24 }
 0x163   : > { %v627_v25 = vpop.f32.mrf.mxu2  ;;  %v836_v26 = vpop.f32.mrf.mxu3 }
 0x164   : > { %v628_v27 = vadd.f32 %v627_v25, %v1506_v37  ;;  %v837_v28 = vadd.f32 %v836_v26, %v1508_v38 }
 0x166   : > { %971 = vst [vmem:[%s1516_s20 + $0x390] sm:$0xff] %v628_v27  ;;  %v534_v29 = vpop.f32.mrf.mxu0  ;;  %v743_v30 = vpop.f32.mrf.mxu1 }
 0x167   : > { %972 = vst [vmem:[%s1516_s20 + $0x398] sm:$0xff] %v837_v28  ;;  %v535_v31 = vadd.f32 %v534_v29, %v1506_v37  ;;  %v744_v32 = vadd.f32 %v743_v30, %v1508_v38 }
 0x169   : > { %909 = vst [vmem:[%s1516_s20 + $0x1a0] sm:$0xff] %v535_v31 }
 0x16a   : > { %910 = vst [vmem:[%s1516_s20 + $0x1a8] sm:$0xff] %v744_v32 }
 0x16b   : > { %v630_v33 = vpop.f32.mrf.mxu2  ;;  %v839_v34 = vpop.f32.mrf.mxu3 }
 0x16c   : > { %v631_v35 = vadd.f32 %v630_v33, %v1506_v37  ;;  %v840_v36 = vadd.f32 %v839_v34, %v1508_v38 }
 0x16e   : > { %973 = vst [vmem:[%s1516_s20 + $0x3a0] sm:$0xff] %v631_v35  ;;  %v537_v39 = vpop.f32.mrf.mxu0  ;;  %v746_v40 = vpop.f32.mrf.mxu1 }
 0x16f   : > { %974 = vst [vmem:[%s1516_s20 + $0x3a8] sm:$0xff] %v840_v36  ;;  %v538_v41 = vadd.f32 %v537_v39, %v1506_v37  ;;  %v747_v42 = vadd.f32 %v746_v40, %v1508_v38 }
 0x171   : > { %911 = vst [vmem:[%s1516_s20 + $0x1b0] sm:$0xff] %v538_v41 }
 0x172   : > { %912 = vst [vmem:[%s1516_s20 + $0x1b8] sm:$0xff] %v747_v42 }
 0x173   : > { %v633_v43 = vpop.f32.mrf.mxu2  ;;  %v842_v44 = vpop.f32.mrf.mxu3 }
 0x174   : > { %v634_v45 = vadd.f32 %v633_v43, %v1506_v37  ;;  %v843_v46 = vadd.f32 %v842_v44, %v1508_v38 }
 0x176   : > { %975 = vst [vmem:[%s1516_s20 + $0x3b0] sm:$0xff] %v634_v45  ;;  %v540_v47 = vpop.f32.mrf.mxu0  ;;  %v749_v48 = vpop.f32.mrf.mxu1 }
 0x177   : > { %976 = vst [vmem:[%s1516_s20 + $0x3b8] sm:$0xff] %v843_v46  ;;  %v541_v49 = vadd.f32 %v540_v47, %v1506_v37  ;;  %v750_v50 = vadd.f32 %v749_v48, %v1508_v38 }
 0x179   : > { %913 = vst [vmem:[%s1516_s20 + $0x1c0] sm:$0xff] %v541_v49 }
 0x17a   : > { %914 = vst [vmem:[%s1516_s20 + $0x1c8] sm:$0xff] %v750_v50 }
 0x17b   : > { %v636_v51 = vpop.f32.mrf.mxu2  ;;  %v845_v52 = vpop.f32.mrf.mxu3 }
 0x17c   : > { %v637_v53 = vadd.f32 %v636_v51, %v1506_v37  ;;  %v846_v54 = vadd.f32 %v845_v52, %v1508_v38 }
 0x17e   : > { %977 = vst [vmem:[%s1516_s20 + $0x3c0] sm:$0xff] %v637_v53  ;;  %v543_v55 = vpop.f32.mrf.mxu0  ;;  %v752_v56 = vpop.f32.mrf.mxu1 }
 0x17f   : > { %978 = vst [vmem:[%s1516_s20 + $0x3c8] sm:$0xff] %v846_v54  ;;  %v544_v57 = vadd.f32 %v543_v55, %v1506_v37  ;;  %v753_v58 = vadd.f32 %v752_v56, %v1508_v38 }
 0x181   : > { %915 = vst [vmem:[%s1516_s20 + $0x1d0] sm:$0xff] %v544_v57 }
 0x182   : > { %916 = vst [vmem:[%s1516_s20 + $0x1d8] sm:$0xff] %v753_v58 }
 0x183   : > { %v639_v59 = vpop.f32.mrf.mxu2  ;;  %v848_v60 = vpop.f32.mrf.mxu3 }
 0x184   : > { %v640_v61 = vadd.f32 %v639_v59, %v1506_v37  ;;  %v849_v62 = vadd.f32 %v848_v60, %v1508_v38 }
 0x186   : > { %979 = vst [vmem:[%s1516_s20 + $0x3d0] sm:$0xff] %v640_v61  ;;  %v546_v63 = vpop.f32.mrf.mxu0  ;;  %v755_v0 = vpop.f32.mrf.mxu1 }
 0x187   : > { %980 = vst [vmem:[%s1516_s20 + $0x3d8] sm:$0xff] %v849_v62  ;;  %v547_v1 = vadd.f32 %v546_v63, %v1506_v37  ;;  %v756_v2 = vadd.f32 %v755_v0, %v1508_v38 }
 0x189   : > { %917 = vst [vmem:[%s1516_s20 + $0x1e0] sm:$0xff] %v547_v1 }
 0x18a   : > { %918 = vst [vmem:[%s1516_s20 + $0x1e8] sm:$0xff] %v756_v2 }
 0x18b   : > { %v642_v3 = vpop.f32.mrf.mxu2  ;;  %v851_v4 = vpop.f32.mrf.mxu3 }
 0x18c   : > { %v643_v5 = vadd.f32 %v642_v3, %v1506_v37  ;;  %v852_v6 = vadd.f32 %v851_v4, %v1508_v38 }
 0x18e   : > { %981 = vst [vmem:[%s1516_s20 + $0x3e0] sm:$0xff] %v643_v5  ;;  %v549_v7 = vpop.f32.mrf.mxu0  ;;  %v758_v8 = vpop.f32.mrf.mxu1 }
 0x18f   : > { %982 = vst [vmem:[%s1516_s20 + $0x3e8] sm:$0xff] %v852_v6  ;;  %v550_v9 = vadd.f32 %v549_v7, %v1506_v37  ;;  %v759_v10 = vadd.f32 %v758_v8, %v1508_v38 }
 0x191   : > { %919 = vst [vmem:[%s1516_s20 + $0x1f0] sm:$0xff] %v550_v9 }
 0x192   : > { %920 = vst [vmem:[%s1516_s20 + $0x1f8] sm:$0xff] %v759_v10 }
 0x193   : > { %v645_v11 = vpop.f32.mrf.mxu2  ;;  %v854_v12 = vpop.f32.mrf.mxu3 }
 0x194   : > { %v646_v13 = vadd.f32 %v645_v11, %v1506_v37  ;;  %v855_v14 = vadd.f32 %v854_v12, %v1508_v38 }
 0x196   : > { %983 = vst [vmem:[%s1516_s20 + $0x3f0] sm:$0xff] %v646_v13 }
 0x197   : > { %984 = vst [vmem:[%s1516_s20 + $0x3f8] sm:$0xff] %v855_v14 }
 0x198   : > { %1279 = shalt.err (!%p1276_p3)
}
 0x199   : > { %s1316_s10 = smov 256   ;;  %s1317_s11 = smov 16  }
 0x19a   : > { %1211 = dma.vmem_to_hbm [thread:$0]  (%p1376_p5), %s1000_s16, 16384, %s1002_s28, %s986_s29, %s1316_s10, %s1316_s10, %s1317_s11  }
 0x19b PF: > { %p1217_p4 = scmp.ge.s32.totalorder %s1314_s15, 2  ;;  %s1016_s17 = sand.u32 1, %s1302_s12  }
 0x19c   : > { %s1017_s19 = scalar_lea.sflag [#allocation3], %s1016_s17 }
 0x19d   : > { %p1214_p7 = pnand %p1217_p4, %p1380_p6 }
 0x19f   : > { %p1215_p8 = pneg %p1214_p7 }
 0x1a1   : > { %1297 = dma.done.wait (%p1215_p8), %s1017_s19, 16384  }
 0x1a2   : > { %1299 = vsyncadd (%p1215_p8), %s1017_s19, 4294950912  ;;  %p13_p9 = scmp.ge.s32.totalorder %s1363_s18, 4   ;;  %s1904_s12 = smov %s1306_s13 }
 0x1a3   : > { %s1905_s13 = smov %s1310_s14  ;;  %s1906_s14 = smov %s1374_s21 }
 0x1a4   : > { %s1907_s15 = smov %s1363_s18  ;;  %15 = sbr.rel (!%p13_p9) target bundleno = 3 (0x3), region = 67 }
 0x1a9   :  { %1023 = vsyncpa [#allocation3], 1 }
 0x1aa   :  { %1025 = vsyncpa [#allocation3 + $0x1], 1 }

</bundles_post_ra>
